<compile_context>
chip_gen: v7x
topology: tpu7x:2x2x1
jax: 0.10.0
libtpu: 0.0.40
codegen_flags: <defaults>
</compile_context>

<pallas_src>
import functools

import jax
import jax.numpy as jnp
from jax.experimental import pallas as pl
from jax.experimental.pallas import tpu as pltpu

_LANES = 128
_ROW_ALIGN = 16          # covers f32 (8) and bf16 (16) sublane tiling
_MAX_BLOCK_ROWS = 4096   # (4096, 128) f32 block = 2 MiB per input per buffer


def _round_up(x, m):
    return (x + m - 1) // m * m


def _tversky_sums_kernel(n_ref, x_ref, t_ref, out_ref,
                         acc_tp_ref, acc_x_ref, acc_t_ref,
                         *, block_rows, from_logits):
    i = pl.program_id(0)
    last = pl.num_programs(0) - 1
    groups = block_rows // 8

    @pl.when(i == 0)
    def _():
        acc_tp_ref[...] = jnp.zeros_like(acc_tp_ref)
        acc_x_ref[...] = jnp.zeros_like(acc_x_ref)
        acc_t_ref[...] = jnp.zeros_like(acc_t_ref)

    def load_block():
        xb = x_ref[...].astype(jnp.float32)
        tb = t_ref[...].astype(jnp.float32)
        if from_logits:
            # sigmoid(x) = 1 / (1 + exp(-x)); exp + approx reciprocal run on
            # the EUP, a free slot in this DMA-bound kernel.
            xb = pl.reciprocal(1.0 + jnp.exp(-xb), approx=True)
        return xb, tb

    def accumulate(xb, tb):
        # Layout-preserving reshape: (block_rows, 128) -> (groups, 8, 128)
        # splits the sublane-major vreg stack; sum(axis=0) is a chain of
        # vreg-wide vector adds (VALU only), no XLU work per step.
        acc_tp_ref[...] += jnp.sum((xb * tb).reshape(groups, 8, _LANES), axis=0)
        acc_x_ref[...] += jnp.sum(xb.reshape(groups, 8, _LANES), axis=0)
        acc_t_ref[...] += jnp.sum(tb.reshape(groups, 8, _LANES), axis=0)

    # Hot path: every block except the last is fully in-bounds -> no mask.
    @pl.when(i < last)
    def _():
        xb, tb = load_block()
        accumulate(xb, tb)

    # Last block: mask elements beyond the true element count.  Covers the
    # (<128 element) zero-pad tail and the garbage rows of a partial boundary
    # block, and is correct for the from_logits path as well.
    @pl.when(i == last)
    def _():
        xb, tb = load_block()
        n = n_ref[0]
        row = jax.lax.broadcasted_iota(jnp.int32, (block_rows, _LANES), 0)
        lane = jax.lax.broadcasted_iota(jnp.int32, (block_rows, _LANES), 1)
        gidx = (i * block_rows + row) * _LANES + lane
        valid = gidx < n
        xb = jnp.where(valid, xb, 0.0)
        tb = jnp.where(valid, tb, 0.0)
        accumulate(xb, tb)
        # Single cross-lane/sublane (XLU) reduction at the very end.
        out_ref[0] = jnp.sum(acc_tp_ref[...])
        out_ref[1] = jnp.sum(acc_x_ref[...])
        out_ref[2] = jnp.sum(acc_t_ref[...])


def _tversky_sums(inputs, targets, from_logits):
    x = inputs.reshape(-1)
    t = targets.reshape(-1)
    # Keep native floating dtypes (bf16 stays bf16 in HBM); only promote
    # non-float (bool/int masks) so the kernel always sees a float ref.
    if not jnp.issubdtype(x.dtype, jnp.floating):
        x = x.astype(jnp.float32)
    if not jnp.issubdtype(t.dtype, jnp.floating):
        t = t.astype(jnp.float32)

    n = x.shape[0]
    rows = pl.cdiv(n, _LANES)
    padded = rows * _LANES
    if padded != n:
        # Rare path (element count not a multiple of 128): pad with zeros.
        # The in-kernel mask (true count n) keeps padded elements out of all
        # three sums, including the from_logits path.
        x = jnp.pad(x, (0, padded - n))
        t = jnp.pad(t, (0, padded - n))
    x2 = x.reshape(rows, _LANES)
    t2 = t.reshape(rows, _LANES)

    block_rows = min(_MAX_BLOCK_ROWS, _round_up(rows, _ROW_ALIGN))
    nb = pl.cdiv(rows, block_rows)

    kernel = functools.partial(
        _tversky_sums_kernel, block_rows=block_rows, from_logits=from_logits)

    n_arr = jnp.array([n], dtype=jnp.int32)

    sums = pl.pallas_call(
        kernel,
        out_shape=jax.ShapeDtypeStruct((3,), jnp.float32),
        grid_spec=pltpu.PrefetchScalarGridSpec(
            num_scalar_prefetch=1,
            grid=(nb,),
            in_specs=[
                pl.BlockSpec((block_rows, _LANES), lambda i, n_ref: (i, 0)),
                pl.BlockSpec((block_rows, _LANES), lambda i, n_ref: (i, 0)),
            ],
            out_specs=pl.BlockSpec(memory_space=pltpu.SMEM),
            scratch_shapes=[
                pltpu.VMEM((8, _LANES), jnp.float32),  # TP partials
                pltpu.VMEM((8, _LANES), jnp.float32),  # sum(x) partials
                pltpu.VMEM((8, _LANES), jnp.float32),  # sum(t) partials
            ],
        ),
        compiler_params=pltpu.CompilerParams(
            dimension_semantics=("arbitrary",),
            vmem_limit_bytes=32 * 1024 * 1024,
        ),
    )(n_arr, x2, t2)
    return sums


def focal_tversky_loss(inputs, targets, smooth=1.0, alpha=0.5, beta=0.5,
                       gamma=1.0, from_logits=False):
    """JAX/Pallas equivalent of FocalTverskyLoss.forward."""
    sums = _tversky_sums(inputs, targets, from_logits)
    tp, sum_x, sum_t = sums[0], sums[1], sums[2]
    fp = sum_x - tp            # sum((1 - t) * x)
    fn = sum_t - tp            # sum(t * (1 - x))
    tversky = (tp + smooth) / (tp + alpha * fp + beta * fn + smooth)
    return (1.0 - tversky) ** gamma


if __name__ == "__main__":
    key = jax.random.PRNGKey(0)
    k1, k2, k3, k4 = jax.random.split(key, 4)

    # --- Test 1: probabilities path (from_logits=False), NCHW shape -------
    x_shape = (2, 4, 16, 16)
    inputs = jax.random.uniform(k1, x_shape, dtype=jnp.float32)            # probs in [0, 1]
    targets = (jax.random.uniform(k2, x_shape) > 0.5).astype(jnp.float32)  # binary mask

    loss = focal_tversky_loss(inputs, targets)
    jax.block_until_ready(loss)

    xr = inputs.reshape(-1)
    tr = targets.reshape(-1)
    tp = jnp.sum(xr * tr)
    fp = jnp.sum((1.0 - tr) * xr)
    fn = jnp.sum(tr * (1.0 - xr))
    tversky = (tp + 1.0) / (tp + 0.5 * fp + 0.5 * fn + 1.0)
    ref = (1.0 - tversky) ** 1.0
    assert jnp.allclose(loss, ref, rtol=1e-5, atol=1e-6), (loss, ref)

    # --- Test 2: logits path with a ragged (non-multiple-of-128) size -----
    y_shape = (3, 5, 7, 11)   # 1155 elements -> exercises tail masking
    logits = jax.random.normal(k3, y_shape, dtype=jnp.float32)
    tgt2 = (jax.random.uniform(k4, y_shape) > 0.5).astype(jnp.float32)

    loss2 = focal_tversky_loss(logits, tgt2, from_logits=True)
    jax.block_until_ready(loss2)

    xr2 = jax.nn.sigmoid(logits).reshape(-1)
    tr2 = tgt2.reshape(-1)
    tp2 = jnp.sum(xr2 * tr2)
    fp2 = jnp.sum((1.0 - tr2) * xr2)
    fn2 = jnp.sum(tr2 * (1.0 - xr2))
    tversky2 = (tp2 + 1.0) / (tp2 + 0.5 * fp2 + 0.5 * fn2 + 1.0)
    ref2 = (1.0 - tversky2) ** 1.0
    # Looser tolerance: kernel uses the approximate EUP reciprocal for sigmoid.
    assert jnp.allclose(loss2, ref2, rtol=5e-3, atol=1e-3), (loss2, ref2)

    print("KERNEL_OK")
</pallas_src>

<mosaic_0001>
module attributes {stable_mosaic.version = 11 : i64} {
  func.func @_tversky_sums_kernel(%arg0: i32, %arg1: memref<1xi32, #tpu.memory_space<smem>>, %arg2: memref<16x128xf32, #tpu.memory_space<vmem>>, %arg3: memref<16x128xf32, #tpu.memory_space<vmem>>, %arg4: memref<3xf32, #tpu.memory_space<smem>>, %arg5: memref<8x128xf32, #tpu.memory_space<vmem>>, %arg6: memref<8x128xf32, #tpu.memory_space<vmem>>, %arg7: memref<8x128xf32, #tpu.memory_space<vmem>>) attributes {dimension_semantics = [#tpu.dimension_semantics<arbitrary>], iteration_bounds = array<i64: 1>, scalar_prefetch = 1 : i64, scratch_operands = 3 : i64, tpu.core_type = #tpu.core_type<tc>, window_params = [{transform_indices = @transform_0, window_bounds = array<i64: 16, 128>}, {transform_indices = @transform_1, window_bounds = array<i64: 16, 128>}, {transform_indices = @transform_2, window_bounds = array<i64: 3>}]} {
    %c0_i32 = arith.constant 0 : i32
    %0 = arith.cmpi eq, %arg0, %c0_i32 : i32
    %1 = arith.extui %0 : i1 to i32
    %c0_i32_0 = arith.constant 0 : i32
    %2 = arith.cmpi ne, %1, %c0_i32_0 : i32
    scf.if %2 {
      %cst = arith.constant 0.000000e+00 : f32
      %9 = vector.broadcast %cst : f32 to vector<8x128xf32>
      %c0 = arith.constant 0 : index
      %c0_5 = arith.constant 0 : index
      %10 = vector.load %arg5[%c0, %c0_5] : memref<8x128xf32, #tpu.memory_space<vmem>>, vector<8x128xf32>
      tpu.vector_store %arg5[%c0, %c0_5], %9 {strides = array<i32>} : memref<8x128xf32, #tpu.memory_space<vmem>>, vector<8x128xf32>,
      %cst_6 = arith.constant 0.000000e+00 : f32
      %11 = vector.broadcast %cst_6 : f32 to vector<8x128xf32>
      %c0_7 = arith.constant 0 : index
      %c0_8 = arith.constant 0 : index
      %12 = vector.load %arg6[%c0_7, %c0_8] : memref<8x128xf32, #tpu.memory_space<vmem>>, vector<8x128xf32>
      tpu.vector_store %arg6[%c0_7, %c0_8], %11 {strides = array<i32>} : memref<8x128xf32, #tpu.memory_space<vmem>>, vector<8x128xf32>,
      %cst_9 = arith.constant 0.000000e+00 : f32
      %13 = vector.broadcast %cst_9 : f32 to vector<8x128xf32>
      %c0_10 = arith.constant 0 : index
      %c0_11 = arith.constant 0 : index
      %14 = vector.load %arg7[%c0_10, %c0_11] : memref<8x128xf32, #tpu.memory_space<vmem>>, vector<8x128xf32>
      tpu.vector_store %arg7[%c0_10, %c0_11], %13 {strides = array<i32>} : memref<8x128xf32, #tpu.memory_space<vmem>>, vector<8x128xf32>,
    } else {
    }
    %c0_i32_1 = arith.constant 0 : i32
    %3 = arith.cmpi slt, %arg0, %c0_i32_1 : i32
    %4 = arith.extui %3 : i1 to i32
    %c0_i32_2 = arith.constant 0 : i32
    %5 = arith.cmpi ne, %4, %c0_i32_2 : i32
    scf.if %5 {
      %c0 = arith.constant 0 : index
      %c0_5 = arith.constant 0 : index
      %9 = vector.load %arg2[%c0, %c0_5] : memref<16x128xf32, #tpu.memory_space<vmem>>, vector<16x128xf32>
      %c0_6 = arith.constant 0 : index
      %c0_7 = arith.constant 0 : index
      %10 = vector.load %arg3[%c0_6, %c0_7] : memref<16x128xf32, #tpu.memory_space<vmem>>, vector<16x128xf32>
      %c0_8 = arith.constant 0 : index
      %c0_9 = arith.constant 0 : index
      %11 = vector.load %arg5[%c0_8, %c0_9] : memref<8x128xf32, #tpu.memory_space<vmem>>, vector<8x128xf32>
      %12 = arith.mulf %9, %10 : vector<16x128xf32>
      %13 = vector.shape_cast %12 : vector<16x128xf32> to vector<2x8x128xf32>
      %cst = arith.constant dense<0.000000e+00> : vector<8x128xf32>
      %14 = vector.multi_reduction <add>, %13, %cst [0] : vector<2x8x128xf32> to vector<8x128xf32>
      %15 = arith.addf %11, %14 : vector<8x128xf32>
      %c0_10 = arith.constant 0 : index
      %c0_11 = arith.constant 0 : index
      %16 = vector.load %arg5[%c0_10, %c0_11] : memref<8x128xf32, #tpu.memory_space<vmem>>, vector<8x128xf32>
      tpu.vector_store %arg5[%c0_10, %c0_11], %15 {strides = array<i32>} : memref<8x128xf32, #tpu.memory_space<vmem>>, vector<8x128xf32>,
      %c0_12 = arith.constant 0 : index
      %c0_13 = arith.constant 0 : index
      %17 = vector.load %arg6[%c0_12, %c0_13] : memref<8x128xf32, #tpu.memory_space<vmem>>, vector<8x128xf32>
      %18 = vector.shape_cast %9 : vector<16x128xf32> to vector<2x8x128xf32>
      %cst_14 = arith.constant dense<0.000000e+00> : vector<8x128xf32>
      %19 = vector.multi_reduction <add>, %18, %cst_14 [0] : vector<2x8x128xf32> to vector<8x128xf32>
      %20 = arith.addf %17, %19 : vector<8x128xf32>
      %c0_15 = arith.constant 0 : index
      %c0_16 = arith.constant 0 : index
      %21 = vector.load %arg6[%c0_15, %c0_16] : memref<8x128xf32, #tpu.memory_space<vmem>>, vector<8x128xf32>
      tpu.vector_store %arg6[%c0_15, %c0_16], %20 {strides = array<i32>} : memref<8x128xf32, #tpu.memory_space<vmem>>, vector<8x128xf32>,
      %c0_17 = arith.constant 0 : index
      %c0_18 = arith.constant 0 : index
      %22 = vector.load %arg7[%c0_17, %c0_18] : memref<8x128xf32, #tpu.memory_space<vmem>>, vector<8x128xf32>
      %23 = vector.shape_cast %10 : vector<16x128xf32> to vector<2x8x128xf32>
      %cst_19 = arith.constant dense<0.000000e+00> : vector<8x128xf32>
      %24 = vector.multi_reduction <add>, %23, %cst_19 [0] : vector<2x8x128xf32> to vector<8x128xf32>
      %25 = arith.addf %22, %24 : vector<8x128xf32>
      %c0_20 = arith.constant 0 : index
      %c0_21 = arith.constant 0 : index
      %26 = vector.load %arg7[%c0_20, %c0_21] : memref<8x128xf32, #tpu.memory_space<vmem>>, vector<8x128xf32>
      tpu.vector_store %arg7[%c0_20, %c0_21], %25 {strides = array<i32>} : memref<8x128xf32, #tpu.memory_space<vmem>>, vector<8x128xf32>,
    } else {
    }
    %c0_i32_3 = arith.constant 0 : i32
    %6 = arith.cmpi eq, %arg0, %c0_i32_3 : i32
    %7 = arith.extui %6 : i1 to i32
    %c0_i32_4 = arith.constant 0 : i32
    %8 = arith.cmpi ne, %7, %c0_i32_4 : i32
    scf.if %8 {
      %c0 = arith.constant 0 : index
      %c0_5 = arith.constant 0 : index
      %9 = vector.load %arg2[%c0, %c0_5] : memref<16x128xf32, #tpu.memory_space<vmem>>, vector<16x128xf32>
      %c0_6 = arith.constant 0 : index
      %c0_7 = arith.constant 0 : index
      %10 = vector.load %arg3[%c0_6, %c0_7] : memref<16x128xf32, #tpu.memory_space<vmem>>, vector<16x128xf32>
      %c0_8 = arith.constant 0 : index
      %11 = memref.load %arg1[%c0_8] : memref<1xi32, #tpu.memory_space<smem>>
      %12 = tpu.iota {dimensions = array<i32: 0>} : vector<16x128xi32>
      %13 = tpu.iota {dimensions = array<i32: 1>} : vector<16x128xi32>
      %c16_i32 = arith.constant 16 : i32
      %14 = arith.muli %arg0, %c16_i32 : i32
      %15 = vector.broadcast %14 : i32 to vector<16x128xi32>
      %16 = arith.addi %15, %12 : vector<16x128xi32>
      %c128_i32 = arith.constant 128 : i32
      %17 = vector.broadcast %c128_i32 : i32 to vector<16x128xi32>
      %18 = arith.muli %16, %17 : vector<16x128xi32>
      %19 = arith.addi %18, %13 : vector<16x128xi32>
      %20 = vector.broadcast %11 : i32 to vector<16x128xi32>
      %21 = arith.cmpi slt, %19, %20 : vector<16x128xi32>
      %cst = arith.constant 0.000000e+00 : f32
      %22 = vector.broadcast %cst : f32 to vector<16x128xf32>
      %23 = arith.select %21, %9, %22 : vector<16x128xi1>, vector<16x128xf32>
      %cst_9 = arith.constant 0.000000e+00 : f32
      %24 = vector.broadcast %cst_9 : f32 to vector<16x128xf32>
      %25 = arith.select %21, %10, %24 : vector<16x128xi1>, vector<16x128xf32>
      %c0_10 = arith.constant 0 : index
      %c0_11 = arith.constant 0 : index
      %26 = vector.load %arg5[%c0_10, %c0_11] : memref<8x128xf32, #tpu.memory_space<vmem>>, vector<8x128xf32>
      %27 = arith.mulf %23, %25 : vector<16x128xf32>
      %28 = vector.shape_cast %27 : vector<16x128xf32> to vector<2x8x128xf32>
      %cst_12 = arith.constant dense<0.000000e+00> : vector<8x128xf32>
      %29 = vector.multi_reduction <add>, %28, %cst_12 [0] : vector<2x8x128xf32> to vector<8x128xf32>
      %30 = arith.addf %26, %29 : vector<8x128xf32>
      %c0_13 = arith.constant 0 : index
      %c0_14 = arith.constant 0 : index
      %31 = vector.load %arg5[%c0_13, %c0_14] : memref<8x128xf32, #tpu.memory_space<vmem>>, vector<8x128xf32>
      tpu.vector_store %arg5[%c0_13, %c0_14], %30 {strides = array<i32>} : memref<8x128xf32, #tpu.memory_space<vmem>>, vector<8x128xf32>,
      %c0_15 = arith.constant 0 : index
      %c0_16 = arith.constant 0 : index
      %32 = vector.load %arg6[%c0_15, %c0_16] : memref<8x128xf32, #tpu.memory_space<vmem>>, vector<8x128xf32>
      %33 = vector.shape_cast %23 : vector<16x128xf32> to vector<2x8x128xf32>
      %cst_17 = arith.constant dense<0.000000e+00> : vector<8x128xf32>
      %34 = vector.multi_reduction <add>, %33, %cst_17 [0] : vector<2x8x128xf32> to vector<8x128xf32>
      %35 = arith.addf %32, %34 : vector<8x128xf32>
      %c0_18 = arith.constant 0 : index
      %c0_19 = arith.constant 0 : index
      %36 = vector.load %arg6[%c0_18, %c0_19] : memref<8x128xf32, #tpu.memory_space<vmem>>, vector<8x128xf32>
      tpu.vector_store %arg6[%c0_18, %c0_19], %35 {strides = array<i32>} : memref<8x128xf32, #tpu.memory_space<vmem>>, vector<8x128xf32>,
      %c0_20 = arith.constant 0 : index
      %c0_21 = arith.constant 0 : index
      %37 = vector.load %arg7[%c0_20, %c0_21] : memref<8x128xf32, #tpu.memory_space<vmem>>, vector<8x128xf32>
      %38 = vector.shape_cast %25 : vector<16x128xf32> to vector<2x8x128xf32>
      %cst_22 = arith.constant dense<0.000000e+00> : vector<8x128xf32>
      %39 = vector.multi_reduction <add>, %38, %cst_22 [0] : vector<2x8x128xf32> to vector<8x128xf32>
      %40 = arith.addf %37, %39 : vector<8x128xf32>
      %c0_23 = arith.constant 0 : index
      %c0_24 = arith.constant 0 : index
      %41 = vector.load %arg7[%c0_23, %c0_24] : memref<8x128xf32, #tpu.memory_space<vmem>>, vector<8x128xf32>
      tpu.vector_store %arg7[%c0_23, %c0_24], %40 {strides = array<i32>} : memref<8x128xf32, #tpu.memory_space<vmem>>, vector<8x128xf32>,
      %c0_25 = arith.constant 0 : index
      %c0_26 = arith.constant 0 : index
      %42 = vector.load %arg5[%c0_25, %c0_26] : memref<8x128xf32, #tpu.memory_space<vmem>>, vector<8x128xf32>
      %43 = vector.shape_cast %42 : vector<8x128xf32> to vector<1x8x128xf32>
      %cst_27 = arith.constant dense<0.000000e+00> : vector<1xf32>
      %44 = vector.multi_reduction <add>, %43, %cst_27 [1, 2] : vector<1x8x128xf32> to vector<1xf32>
      %45 = vector.shape_cast %44 : vector<1xf32> to vector<1x1x1xf32>
      %46 = vector.extract %45[0, 0, 0] : f32 from vector<1x1x1xf32>
      %c0_28 = arith.constant 0 : index
      %47 = memref.load %arg4[%c0_28] : memref<3xf32, #tpu.memory_space<smem>>
      memref.store %46, %arg4[%c0_28] : memref<3xf32, #tpu.memory_space<smem>>
      %c0_29 = arith.constant 0 : index
      %c0_30 = arith.constant 0 : index
      %48 = vector.load %arg6[%c0_29, %c0_30] : memref<8x128xf32, #tpu.memory_space<vmem>>, vector<8x128xf32>
      %49 = vector.shape_cast %48 : vector<8x128xf32> to vector<1x8x128xf32>
      %cst_31 = arith.constant dense<0.000000e+00> : vector<1xf32>
      %50 = vector.multi_reduction <add>, %49, %cst_31 [1, 2] : vector<1x8x128xf32> to vector<1xf32>
      %51 = vector.shape_cast %50 : vector<1xf32> to vector<1x1x1xf32>
      %52 = vector.extract %51[0, 0, 0] : f32 from vector<1x1x1xf32>
      %c1 = arith.constant 1 : index
      %53 = memref.load %arg4[%c1] : memref<3xf32, #tpu.memory_space<smem>>
      memref.store %52, %arg4[%c1] : memref<3xf32, #tpu.memory_space<smem>>
      %c0_32 = arith.constant 0 : index
      %c0_33 = arith.constant 0 : index
      %54 = vector.load %arg7[%c0_32, %c0_33] : memref<8x128xf32, #tpu.memory_space<vmem>>, vector<8x128xf32>
      %55 = vector.shape_cast %54 : vector<8x128xf32> to vector<1x8x128xf32>
      %cst_34 = arith.constant dense<0.000000e+00> : vector<1xf32>
      %56 = vector.multi_reduction <add>, %55, %cst_34 [1, 2] : vector<1x8x128xf32> to vector<1xf32>
      %57 = vector.shape_cast %56 : vector<1xf32> to vector<1x1x1xf32>
      %58 = vector.extract %57[0, 0, 0] : f32 from vector<1x1x1xf32>
      %c2 = arith.constant 2 : index
      %59 = memref.load %arg4[%c2] : memref<3xf32, #tpu.memory_space<smem>>
      memref.store %58, %arg4[%c2] : memref<3xf32, #tpu.memory_space<smem>>
    } else {
    }
    return
  }
  func.func @transform_0(%arg0: i32, %arg1: memref<1xi32, #tpu.memory_space<smem>>) -> (i32, i32) {
    %c0_i32 = arith.constant 0 : i32
    %c0_i32_0 = arith.constant 0 : i32
    return %arg0, %c0_i32 : i32, i32
  }
  func.func @transform_1(%arg0: i32, %arg1: memref<1xi32, #tpu.memory_space<smem>>) -> (i32, i32) {
    %c0_i32 = arith.constant 0 : i32
    %c0_i32_0 = arith.constant 0 : i32
    return %arg0, %c0_i32 : i32, i32
  }
  func.func @transform_2(%arg0: i32, %arg1: memref<1xi32, #tpu.memory_space<smem>>) -> i32 {
    %c0_i32 = arith.constant 0 : i32
    %c0_i32_0 = arith.constant 0 : i32
    return %c0_i32 : i32
  }
}

</mosaic_0001>

<bundles_post_ra>
// kernel: tpu_custom_call.1
= control target key start
LH: loop header
LB: loop body
LE: loop exit
PB: predicated region body
PF: predicated region fallthrough
CT: control target
= control target key end

     0   :  { %9 = vsyncpa [#allocation8], 0  ;;  %s299_s0 = inlined_call_operand.<no memory space> [shape: s32[1], index: 0, kind: input, shape index: {}]   ;;  %s300_s1 = inlined_call_operand.hbm [shape: f32[16,128], index: 1, kind: input, shape index: {}]   ;;  %s301_s2 = inlined_call_operand.hbm [shape: f32[16,128], index: 2, kind: input, shape index: {}]   ;;  %s302_s3 = inlined_call_operand.hbm [shape: f32[3], index: 3, kind: output, shape index: {}]  }
   0x1   :  { %10 = vsyncpa [#allocation11], 0 }
   0x2   :  { %11 = vsyncpa [#allocation9], 0  ;;  %s235_s12 = smov [#allocation7]   ;;  %s175_s16 = scalar_lea.hbm %s300_s1, 256 }
   0x3   :  { %s17_s13 = sshll.u32 %s235_s12, 4  ;;  %p176_p0 = scmp.ne.s32.totalorder %s300_s1, %s175_s16  ;;  %s18_s13 = int_to_ptr.vmem [resolvable:$true] %s17_s13 }
   0x4   :  { %p179_p1 = scmp.lt.u32.totalorder %s175_s16, %s300_s1 }
   0x6   :  { %p181_p2 = pnand %p179_p1, %p176_p0 }
   0x8   :  { %184 = shalt.err (!%p181_p2)
}
   0x9   :  { %s185_s21 = scalar_lea.vmem %s18_s13, 256  ;;  %p190_p4 = scmp.lt.s32.totalorder %s18_s13, %s18_s13 }
   0xa   :  { %p186_p3 = scmp.ne.s32.totalorder %s18_s13, %s185_s21  ;;  %p191_p5 = scmp.lt.s32.totalorder %s185_s21, %s185_s21 }
   0xc   :  { %p192_p6 = por %p191_p5, %p190_p4 }
   0xe   :  { %p193_p7 = pnand %p192_p6, %p186_p3 }
  0x10   :  { %196 = shalt.err (!%p193_p7)
}
  0x11   :  { %s236_s22 = smov 128   ;;  %s237_s23 = smov 8  }
  0x12   :  { %23 = dma.hbm_to_vmem [thread:$0]  %s300_s1, 256, %s18_s13, [#allocation8], %s236_s22, %s236_s22, %s237_s23  }
  0x13   :  { %s238_s26 = smov [#allocation10]   ;;  %s197_s30 = scalar_lea.hbm %s301_s2, 256 }
  0x14   :  { %s29_s27 = sshll.u32 %s238_s26, 4  ;;  %p198_p8 = scmp.ne.s32.totalorder %s301_s2, %s197_s30  ;;  %s30_s27 = int_to_ptr.vmem [resolvable:$true] %s29_s27 }
  0x15   :  { %p201_p9 = scmp.lt.u32.totalorder %s197_s30, %s301_s2 }
  0x17   :  { %p203_p10 = pnand %p201_p9, %p198_p8 }
  0x19   :  { %206 = shalt.err (!%p203_p10)
}
  0x1a   :  { %s207_s8 = scalar_lea.vmem %s30_s27, 256  ;;  %p212_p12 = scmp.lt.s32.totalorder %s30_s27, %s30_s27 }
  0x1b   :  { %p208_p11 = scmp.ne.s32.totalorder %s30_s27, %s207_s8  ;;  %p213_p13 = scmp.lt.s32.totalorder %s207_s8, %s207_s8 }
  0x1d   :  { %p214_p0 = por %p213_p13, %p212_p12 }
  0x1f   :  { %p215_p1 = pnand %p214_p0, %p208_p11 }
  0x21   :  { %218 = shalt.err (!%p215_p1)
}
  0x22   :  { %35 = dma.hbm_to_vmem [thread:$0]  %s301_s2, 256, %s30_s27, [#allocation11], %s236_s22, %s236_s22, %s237_s23  }
  0x23   :  { %229 = dma.done.wait [#allocation8], 256  }
  0x24   :  { %230 = vsyncadd [#allocation8], 4294967040 }
  0x25   :  { %231 = dma.done.wait [#allocation11], 256  }
  0x26   :  { %232 = vsyncadd [#allocation11], 4294967040  ;;  %v79_v0 = vlaneseq  ;;  %v92_v5 = vstv %s299_s0  ;;  %v76_v8 = vld [vmem:[#allocation10] sm:$0xff]  ;;  %v74_v9 = vld [vmem:[#allocation7] sm:$0xff]  ;;  %s219_s15 = scalar_lea.hbm %s302_s3, 16 }
  0x27   :  { %v77_v10 = vld [vmem:[#allocation10 + $0x8] sm:$0xff]  ;;  %v75_v12 = vld [vmem:[#allocation7 + $0x8] sm:$0xff]  ;;  %p220_p2 = scmp.ne.s32.totalorder %s302_s3, %s219_s15  ;;  %p223_p3 = scmp.lt.u32.totalorder %s219_s15, %s302_s3 }
  0x28   :  { %v80_v1 = vshrl.u32 %v79_v0, 7  ;;  %v83_v2 = vand.u32 127, %v79_v0 }
  0x29   :  { %p225_p4 = pnand %p223_p3, %p220_p2 }
  0x2a   :  { %v81_v3 = vadd.s32 8, %v80_v1  ;;  %v88_v4 = vmul.u32 128, %v80_v1 }
  0x2c   :  { %v89_v6 = vmul.u32 128, %v81_v3  ;;  %v90_v7 = vadd.s32 %v88_v4, %v83_v2 }
  0x2e   :  { %v91_v11 = vadd.s32 %v89_v6, %v83_v2  ;;  %vm93_vm0 = vcmp.lt.s32.totalorder %v90_v7, %v92_v5 }
  0x2f   :  { %v97_v13 = vsel %vm93_vm0, %v76_v8, 0.0  ;;  %v95_v14 = vsel %vm93_vm0, %v74_v9, 0.0 }
  0x30   :  { %vm94_vm1 = vcmp.lt.s32.totalorder %v91_v11, %v92_v5  ;;  %v100_v15 = vmul.f32 %v97_v13, %v95_v14 }
  0x31   :  { %v98_v16 = vsel %vm94_vm1, %v77_v10, 0.0  ;;  %v96_v17 = vsel %vm94_vm1, %v75_v12, 0.0 }
  0x32   :  { %v110_v18 = vadd.f32 %v98_v16, %v97_v13  ;;  %v101_v19 = vmul.f32 %v98_v16, %v96_v17  ;;  %v106_v21 = vadd.f32 %v96_v17, %v95_v14 }
  0x34   :  { %138 = vadd.xlane.f32.xlu1 %v110_v18  ;;  %v102_v20 = vadd.f32 %v101_v19, %v100_v15 }
  0x36   :  { %114 = vadd.xlane.f32.xlu0 %v102_v20 }
  0x3a   :  { %126 = vadd.xlane.f32.xlu0 %v106_v21 }
  0xc1   :  { %v139_v22 = vpop.xlane.xlu1 %138 }
  0xc2   :  { %v140_v23 = vrot.slane %v139_v22, 4 }
  0xc3   :  { %v115_v24 = vpop.xlane.xlu0 %114 }
  0xc4   :  { %v141_v25 = vadd.f32 %v140_v23, %v139_v22  ;;  %v116_v26 = vrot.slane %v115_v24, 4 }
  0xc6   :  { %v117_v27 = vadd.f32 %v116_v26, %v115_v24  ;;  %v142_v28 = vrot.slane %v141_v25, 2 }
  0xc7   :  { %v127_v29 = vpop.xlane.xlu0 %126 }
  0xc8   :  { %v118_v30 = vrot.slane %v117_v27, 2  ;;  %v128_v31 = vrot.slane %v127_v29, 4  ;;  %v143_v34 = vadd.f32 %v142_v28, %v141_v25 }
  0xca   :  { %v129_v32 = vadd.f32 %v128_v31, %v127_v29  ;;  %v119_v33 = vadd.f32 %v118_v30, %v117_v27  ;;  %v144_v39 = vrot.slane %v143_v34, 1 }
  0xcc   :  { %v130_v35 = vrot.slane %v129_v32, 2  ;;  %v120_v36 = vrot.slane %v119_v33, 1  ;;  %v145_v42 = vadd.f32 %v144_v39, %v143_v34 }
  0xce   :  { %v131_v37 = vadd.f32 %v130_v35, %v129_v32  ;;  %v121_v38 = vadd.f32 %v120_v36, %v119_v33 }
  0xd0   :  { %164 = vpush %v121_v38  ;;  %v132_v40 = vrot.slane %v131_v37, 1 }
  0xd2   :  { %v133_v41 = vadd.f32 %v132_v40, %v131_v37 }
  0xd4   :  { %166 = vpush %v133_v41 }
  0xd5   :  { %168 = vpush %v145_v42 }
 0x101   :  { %s165_s0 = spop %164 }
 0x102   :  { %124 = sst [smem:[#allocation12]] %s165_s0 }
 0x105   :  { %s167_s2 = spop %166 }
 0x106   :  { %136 = sst [smem:[#allocation12 + $0x1]] %s167_s2  ;;  %s169_s12 = spop %168 }
 0x107   :  { %148 = sst [smem:[#allocation12 + $0x2]] %s169_s12 }
 0x108   :  { %228 = shalt.err (!%p225_p4)
}
 0x109   :  { %s239_s20 = smov [#allocation12]  }
 0x10a   :  { %156 = dma.smem_to_hbm %s239_s20, 16, %s302_s3, [#allocation9]  }
 0x10b   :  { %233 = dma.done.wait [#allocation9], 16  }
 0x10c   :  { %234 = vsyncadd [#allocation9], 4294967280 }
 0x10d   :  { %160 = sfence }
 0x10e   :  { %161 = vsyncpa [#allocation8], 1 }
 0x10f   :  { %162 = vsyncpa [#allocation11], 1 }
 0x110   :  { %163 = vsyncpa [#allocation9], 1 }

</bundles_post_ra>
